<compile_context>
chip_gen: v6e
topology: v6e:2x2x1
jax: 0.10.0
libtpu: 0.0.40
codegen_flags: <defaults>
</compile_context>

<pallas_src>
import functools
from typing import NamedTuple, Tuple

import jax
import jax.numpy as jnp
from jax.experimental import pallas as pl
from jax.experimental.pallas import tpu as pltpu

_LANE = 128                      # lane width (last-dim alignment)
_SUBLANE = 8                     # f32 sublane (second-to-last dim alignment)
_VMEM_BUDGET = 48 * 1024 * 1024  # conservative: fits v7x's 64 MiB with headroom


def _round_up(n: int, m: int) -> int:
    return ((n + m - 1) // m) * m


# --------------------------------------------------------------------------
# Capability probe: single-buffered grid-invariant blocks (pl.Buffered(1)).
# --------------------------------------------------------------------------
@functools.lru_cache(maxsize=None)
def _single_buffer_supported() -> bool:
    """True iff pipeline_mode=pl.Buffered(1) builds, lowers and runs here."""
    if not hasattr(pl, "Buffered"):
        return False
    try:
        spec = pl.BlockSpec((8, 128), lambda i: (0, 0),
                            pipeline_mode=pl.Buffered(1))

        def _copy(x_ref, o_ref):
            o_ref[...] = x_ref[...] + 1.0

        fn = pl.pallas_call(
            _copy,
            out_shape=jax.ShapeDtypeStruct((8, 128), jnp.float32),
            grid=(1,),
            in_specs=[spec],
            out_specs=pl.BlockSpec((8, 128), lambda i: (0, 0)),
        )
        jax.block_until_ready(fn(jnp.zeros((8, 128), jnp.float32)))
        return True
    except Exception:
        return False


def _const_spec(block_shape, single_buffer: bool) -> pl.BlockSpec:
    """BlockSpec for a grid-invariant (weight/bias) block."""
    if single_buffer:
        return pl.BlockSpec(block_shape, lambda m: (0, 0),
                            pipeline_mode=pl.Buffered(1))
    return pl.BlockSpec(block_shape, lambda m: (0, 0))


# --------------------------------------------------------------------------
# One-time parameter preprocessing (hoisted out of the per-call path).
# --------------------------------------------------------------------------
class MLPMeta(NamedTuple):
    dims: Tuple[int, ...]        # logical feature dims, len = num_layers + 1
    dims_p: Tuple[int, ...]      # lane-padded feature dims
    use_bf16_mxu: bool
    single_buffer_weights: bool


def prepare_mlp_params(params, use_bf16_mxu: bool = False):
    """Transpose to (in, out), zero-pad to lane multiples and cast weights to
    the MXU operand dtype ONCE.  Reuse (blocks, meta) across forward calls."""
    num_layers = len(params)
    in_dim = int(params[0][0].shape[1])
    dims = (in_dim,) + tuple(int(w.shape[0]) for (w, _b) in params)
    dims_p = tuple(_round_up(d, _LANE) for d in dims)
    w_dtype = jnp.bfloat16 if use_bf16_mxu else jnp.float32

    blocks = []
    for i, (w, b) in enumerate(params):
        o_i, i_i = w.shape
        w_t = jnp.zeros((dims_p[i], dims_p[i + 1]), w_dtype)
        w_t = w_t.at[:i_i, :o_i].set(jnp.transpose(w).astype(w_dtype))
        b_p = jnp.zeros((1, dims_p[i + 1]), jnp.float32)
        b_p = b_p.at[0, :o_i].set(b.astype(jnp.float32))
        blocks += [w_t, b_p]
    assert num_layers >= 1

    meta = MLPMeta(dims=dims, dims_p=dims_p, use_bf16_mxu=use_bf16_mxu,
                   single_buffer_weights=_single_buffer_supported())
    return tuple(blocks), meta


# --------------------------------------------------------------------------
# Fused kernel: the running activation never leaves VMEM/vregs.
# --------------------------------------------------------------------------
def _fused_mlp_kernel(*refs, num_layers: int):
    """refs = (x, w0, b0, w1, b1, ..., w_{L-1}, b_{L-1}, out).

    x   : (tm, d0_p)          VMEM  (batch tile, padded input features)
    w_i : (d_i_p, d_{i+1}_p)  VMEM  (pre-transposed, pre-cast, padded)
    b_i : (1, d_{i+1}_p)      VMEM  (f32)
    out : (tm, dL_p)          VMEM
    """
    x_ref = refs[0]
    o_ref = refs[-1]

    h = x_ref[...]  # f32 activation, stays on-chip across all layers
    for i in range(num_layers):
        w = refs[1 + 2 * i][...]
        b = refs[2 + 2 * i][...]
        # Only the (cheap, per-tile) activation cast happens in-kernel; the
        # weight is already in its MXU operand dtype.
        lhs = h.astype(w.dtype) if w.dtype != h.dtype else h
        h = jnp.dot(lhs, w, preferred_element_type=jnp.float32) + b
        if i < num_layers - 1:
            h = jnp.maximum(h, 0.0)     # ReLU, f32 epilogue (VPU)
    o_ref[...] = h.astype(o_ref.dtype)


# --------------------------------------------------------------------------
# Batch-tile selection (>=2 tiles for v7x dual TC; VMEM-budget aware).
# --------------------------------------------------------------------------
def _act_bytes(tm: int, dims_p: Tuple[int, ...]) -> int:
    io = 2 * tm * (dims_p[0] + dims_p[-1]) * 4     # double-buffered x/out tiles
    inter = 3 * tm * max(dims_p) * 4               # live activation / matmul temps
    return io + inter


def _choose_tm(batch: int, dims_p: Tuple[int, ...], resident_weight_bytes: int) -> int:
    if batch <= _SUBLANE:
        return _round_up(max(batch, _SUBLANE), _SUBLANE)
    # At least two batch tiles so both v7x TensorCores get work; large batches
    # get up to 512-row tiles to amortize per-grid-step overhead.
    half = _round_up((batch + 1) // 2, _SUBLANE)
    tm = min(512, half)
    while tm > _SUBLANE and resident_weight_bytes + _act_bytes(tm, dims_p) > _VMEM_BUDGET:
        tm = _round_up(tm // 2, _SUBLANE)
    return max(tm, _SUBLANE)


# --------------------------------------------------------------------------
# Forward pass (jitted; `meta` is static, `blocks` are device arrays).
# --------------------------------------------------------------------------
@functools.partial(jax.jit, static_argnames=("meta",))
def mlp_forward(x, blocks, *, meta: MLPMeta):
    batch, in_dim = x.shape
    dims_p = meta.dims_p
    num_layers = len(meta.dims) - 1
    out_dim = meta.dims[-1]
    assert in_dim == meta.dims[0], (in_dim, meta.dims[0])

    w_bytes = 2 if meta.use_bf16_mxu else 4
    weight_buf = 1 if meta.single_buffer_weights else 2
    weight_elems = sum(dims_p[i] * dims_p[i + 1] for i in range(num_layers))
    bias_elems = sum(dims_p[i + 1] for i in range(num_layers))
    resident_weight_bytes = (weight_elems * w_bytes +
                             bias_elems * 4 * _SUBLANE) * weight_buf

    tm = _choose_tm(batch, dims_p, resident_weight_bytes)
    batch_p = _round_up(batch, tm)
    num_tiles = batch_p // tm

    # Pad x only when actually needed (aligned shapes skip the extra HBM copy).
    if batch_p != batch or dims_p[0] != in_dim:
        x_p = jnp.zeros((batch_p, dims_p[0]), jnp.float32)
        x_p = x_p.at[:batch, :in_dim].set(x.astype(jnp.float32))
    else:
        x_p = x.astype(jnp.float32)

    in_specs = [pl.BlockSpec((tm, dims_p[0]), lambda m: (m, 0))]
    for i in range(num_layers):
        in_specs.append(_const_spec((dims_p[i], dims_p[i + 1]),
                                    meta.single_buffer_weights))
        in_specs.append(_const_spec((1, dims_p[i + 1]),
                                    meta.single_buffer_weights))

    vmem_needed = resident_weight_bytes + _act_bytes(tm, dims_p)
    vmem_limit = int(min(max(1.5 * vmem_needed, 32 * 1024 * 1024),
                         100 * 1024 * 1024))

    flops = 2 * batch_p * weight_elems
    bytes_accessed = (batch_p * dims_p[0] * 4 + batch_p * dims_p[-1] * 4 +
                      weight_elems * w_bytes + bias_elems * 4)
    cost = pl.CostEstimate(flops=int(flops), transcendentals=0,
                           bytes_accessed=int(bytes_accessed))

    kernel = functools.partial(_fused_mlp_kernel, num_layers=num_layers)

    out_p = pl.pallas_call(
        kernel,
        out_shape=jax.ShapeDtypeStruct((batch_p, dims_p[-1]), jnp.float32),
        grid_spec=pl.GridSpec(
            grid=(num_tiles,),
            in_specs=in_specs,
            out_specs=pl.BlockSpec((tm, dims_p[-1]), lambda m: (m, 0)),
        ),
        compiler_params=pltpu.CompilerParams(
            dimension_semantics=("parallel",),   # batch tiles shard across TCs
            vmem_limit_bytes=vmem_limit,
        ),
        cost_estimate=cost,
    )(x_p, *blocks)

    if batch_p != batch or dims_p[-1] != out_dim:
        return out_p[:batch, :out_dim]
    return out_p


def mlp_classifier_forward(x, params, use_bf16_mxu: bool = False):
    """Convenience wrapper: prepare params then run (prefer preparing once)."""
    blocks, meta = prepare_mlp_params(params, use_bf16_mxu=use_bf16_mxu)
    return mlp_forward(x, blocks, meta=meta)


# --------------------------------------------------------------------------
# Reference / init / demo
# --------------------------------------------------------------------------
def init_mlp_params(key, input_dim, hidden_dim, output_dim, num_layers):
    """Deterministic init matching MLPClassifier layer shapes (PyTorch layout)."""
    dims = [input_dim] + [hidden_dim] * (num_layers - 1) + [output_dim]
    params = []
    for i in range(num_layers):
        fan_in, fan_out = dims[i], dims[i + 1]
        key, wk, bk = jax.random.split(key, 3)
        bound = 1.0 / jnp.sqrt(fan_in)
        w = jax.random.uniform(wk, (fan_out, fan_in), jnp.float32, -bound, bound)
        b = jax.random.uniform(bk, (fan_out,), jnp.float32, -bound, bound)
        params.append((w, b))
    return params


def mlp_reference(x, params):
    """Pure-JAX reference for correctness check."""
    n = len(params)
    h = x
    for i, (w, b) in enumerate(params):
        h = h @ w.T + b
        if i < n - 1:
            h = jnp.maximum(h, 0.0)
    return h


if __name__ == "__main__":
    input_dim = 32
    hidden_dim = 32
    output_dim = 8
    num_layers = 3

    key = jax.random.PRNGKey(0)
    key, xk1, xk2 = jax.random.split(key, 3)
    params = init_mlp_params(key, input_dim, hidden_dim, output_dim, num_layers)

    # ---- small batch (single tile), f32 MXU path: exact vs reference -------
    x_small = jax.random.normal(xk1, (2, input_dim), jnp.float32)
    ref_small = mlp_reference(x_small, params)

    blocks_f32, meta_f32 = prepare_mlp_params(params, use_bf16_mxu=False)
    out_small = jax.block_until_ready(mlp_forward(x_small, blocks_f32, meta=meta_f32))
    assert out_small.shape == (2, output_dim), out_small.shape
    assert jnp.allclose(out_small, ref_small, atol=1e-5, rtol=1e-5), (
        float(jnp.max(jnp.abs(out_small - ref_small)))
    )

    # ---- medium batch (>=2 tiles, padded rows), f32 path --------------------
    x_med = jax.random.normal(xk2, (20, input_dim), jnp.float32)
    ref_med = mlp_reference(x_med, params)
    out_med = jax.block_until_ready(mlp_forward(x_med, blocks_f32, meta=meta_f32))
    assert out_med.shape == (20, output_dim), out_med.shape
    assert jnp.allclose(out_med, ref_med, atol=1e-5, rtol=1e-5), (
        float(jnp.max(jnp.abs(out_med - ref_med)))
    )

    # ---- bf16 MXU-operand path (weights pre-cast wrapper-side) --------------
    blocks_bf16, meta_bf16 = prepare_mlp_params(params, use_bf16_mxu=True)
    out_bf16 = jax.block_until_ready(mlp_forward(x_small, blocks_bf16, meta=meta_bf16))
    assert jnp.allclose(out_bf16, ref_small, atol=5e-2, rtol=5e-2), (
        float(jnp.max(jnp.abs(out_bf16 - ref_small)))
    )

    print("KERNEL_OK")
</pallas_src>

<mosaic_0001>
module attributes {stable_mosaic.version = 11 : i64} {
  func.func @_copy(%arg0: i32, %arg1: memref<8x128xf32, #tpu.memory_space<vmem>>, %arg2: memref<8x128xf32, #tpu.memory_space<vmem>>) attributes {dimension_semantics = [#tpu.dimension_semantics<arbitrary>], iteration_bounds = array<i64: 1>, scalar_prefetch = 0 : i64, scratch_operands = 0 : i64, tpu.core_type = #tpu.core_type<tc>, window_params = [{pipeline_mode = #tpu.pipeline_mode<synchronous>, transform_indices = @transform_0, window_bounds = array<i64: 8, 128>}, {pipeline_mode = #tpu.pipeline_mode<synchronous>, transform_indices = @transform_1, window_bounds = array<i64: 8, 128>}]} {
    %c0 = arith.constant 0 : index
    %c0_0 = arith.constant 0 : index
    %0 = vector.load %arg1[%c0, %c0_0] : memref<8x128xf32, #tpu.memory_space<vmem>>, vector<8x128xf32>
    %cst = arith.constant 1.000000e+00 : f32
    %1 = vector.broadcast %cst : f32 to vector<8x128xf32>
    %2 = arith.addf %0, %1 : vector<8x128xf32>
    %c0_1 = arith.constant 0 : index
    %c0_2 = arith.constant 0 : index
    %3 = vector.load %arg2[%c0_1, %c0_2] : memref<8x128xf32, #tpu.memory_space<vmem>>, vector<8x128xf32>
    tpu.vector_store %arg2[%c0_1, %c0_2], %2 {strides = array<i32>} : memref<8x128xf32, #tpu.memory_space<vmem>>, vector<8x128xf32>,
    return
  }
  func.func @transform_0(%arg0: i32) -> (i32, i32) {
    %c0_i32 = arith.constant 0 : i32
    %c0_i32_0 = arith.constant 0 : i32
    %c0_i32_1 = arith.constant 0 : i32
    return %c0_i32, %c0_i32_0 : i32, i32
  }
  func.func @transform_1(%arg0: i32) -> (i32, i32) {
    %c0_i32 = arith.constant 0 : i32
    %c0_i32_0 = arith.constant 0 : i32
    %c0_i32_1 = arith.constant 0 : i32
    return %c0_i32, %c0_i32_0 : i32, i32
  }
}

module attributes {stable_mosaic.version = 11 : i64} {
  func.func @_fused_mlp_kernel(%arg0: i32, %arg1: memref<8x128xf32, #tpu.memory_space<vmem>>, %arg2: memref<128x128xf32, #tpu.memory_space<vmem>>, %arg3: memref<1x128xf32, #tpu.memory_space<vmem>>, %arg4: memref<128x128xf32, #tpu.memory_space<vmem>>, %arg5: memref<1x128xf32, #tpu.memory_space<vmem>>, %arg6: memref<128x128xf32, #tpu.memory_space<vmem>>, %arg7: memref<1x128xf32, #tpu.memory_space<vmem>>, %arg8: memref<8x128xf32, #tpu.memory_space<vmem>>) attributes {dimension_semantics = [#tpu.dimension_semantics<parallel>], iteration_bounds = array<i64: 1>, scalar_prefetch = 0 : i64, scratch_operands = 0 : i64, tpu.core_type = #tpu.core_type<tc>, window_params = [{transform_indices = @transform_0, window_bounds = array<i64: 8, 128>}, {pipeline_mode = #tpu.pipeline_mode<synchronous>, transform_indices = @transform_1, window_bounds = array<i64: 128, 128>}, {pipeline_mode = #tpu.pipeline_mode<synchronous>, transform_indices = @transform_2, window_bounds = array<i64: 1, 128>}, {pipeline_mode = #tpu.pipeline_mode<synchronous>, transform_indices = @transform_3, window_bounds = array<i64: 128, 128>}, {pipeline_mode = #tpu.pipeline_mode<synchronous>, transform_indices = @transform_4, window_bounds = array<i64: 1, 128>}, {pipeline_mode = #tpu.pipeline_mode<synchronous>, transform_indices = @transform_5, window_bounds = array<i64: 128, 128>}, {pipeline_mode = #tpu.pipeline_mode<synchronous>, transform_indices = @transform_6, window_bounds = array<i64: 1, 128>}, {transform_indices = @transform_7, window_bounds = array<i64: 8, 128>}]} {
    %c0 = arith.constant 0 : index
    %c0_0 = arith.constant 0 : index
    %0 = vector.load %arg1[%c0, %c0_0] : memref<8x128xf32, #tpu.memory_space<vmem>>, vector<8x128xf32>
    %c0_1 = arith.constant 0 : index
    %c0_2 = arith.constant 0 : index
    %1 = vector.load %arg2[%c0_1, %c0_2] : memref<128x128xf32, #tpu.memory_space<vmem>>, vector<128x128xf32>
    %c0_3 = arith.constant 0 : index
    %c0_4 = arith.constant 0 : index
    %2 = vector.load %arg3[%c0_3, %c0_4] : memref<1x128xf32, #tpu.memory_space<vmem>>, vector<1x128xf32>
    %cst = arith.constant dense<0.000000e+00> : vector<8x128xf32>
    %3 = tpu.matmul %0, %1, %cst {dimension_numbers = #tpu.dot_dimension_numbers<[1], [0], [0], [1], [0, 0, 1, 1], [], []>} : vector<8x128xf32>, vector<128x128xf32>, vector<8x128xf32> -> vector<8x128xf32>
    %4 = vector.broadcast %2 : vector<1x128xf32> to vector<8x128xf32>
    %5 = arith.addf %3, %4 : vector<8x128xf32>
    %cst_5 = arith.constant 0.000000e+00 : f32
    %6 = vector.broadcast %cst_5 : f32 to vector<8x128xf32>
    %7 = arith.maximumf %5, %6 : vector<8x128xf32>
    %c0_6 = arith.constant 0 : index
    %c0_7 = arith.constant 0 : index
    %8 = vector.load %arg4[%c0_6, %c0_7] : memref<128x128xf32, #tpu.memory_space<vmem>>, vector<128x128xf32>
    %c0_8 = arith.constant 0 : index
    %c0_9 = arith.constant 0 : index
    %9 = vector.load %arg5[%c0_8, %c0_9] : memref<1x128xf32, #tpu.memory_space<vmem>>, vector<1x128xf32>
    %cst_10 = arith.constant dense<0.000000e+00> : vector<8x128xf32>
    %10 = tpu.matmul %7, %8, %cst_10 {dimension_numbers = #tpu.dot_dimension_numbers<[1], [0], [0], [1], [0, 0, 1, 1], [], []>} : vector<8x128xf32>, vector<128x128xf32>, vector<8x128xf32> -> vector<8x128xf32>
    %11 = vector.broadcast %9 : vector<1x128xf32> to vector<8x128xf32>
    %12 = arith.addf %10, %11 : vector<8x128xf32>
    %cst_11 = arith.constant 0.000000e+00 : f32
    %13 = vector.broadcast %cst_11 : f32 to vector<8x128xf32>
    %14 = arith.maximumf %12, %13 : vector<8x128xf32>
    %c0_12 = arith.constant 0 : index
    %c0_13 = arith.constant 0 : index
    %15 = vector.load %arg6[%c0_12, %c0_13] : memref<128x128xf32, #tpu.memory_space<vmem>>, vector<128x128xf32>
    %c0_14 = arith.constant 0 : index
    %c0_15 = arith.constant 0 : index
    %16 = vector.load %arg7[%c0_14, %c0_15] : memref<1x128xf32, #tpu.memory_space<vmem>>, vector<1x128xf32>
    %cst_16 = arith.constant dense<0.000000e+00> : vector<8x128xf32>
    %17 = tpu.matmul %14, %15, %cst_16 {dimension_numbers = #tpu.dot_dimension_numbers<[1], [0], [0], [1], [0, 0, 1, 1], [], []>} : vector<8x128xf32>, vector<128x128xf32>, vector<8x128xf32> -> vector<8x128xf32>
    %18 = vector.broadcast %16 : vector<1x128xf32> to vector<8x128xf32>
    %19 = arith.addf %17, %18 : vector<8x128xf32>
    %c0_17 = arith.constant 0 : index
    %c0_18 = arith.constant 0 : index
    %20 = vector.load %arg8[%c0_17, %c0_18] : memref<8x128xf32, #tpu.memory_space<vmem>>, vector<8x128xf32>
    tpu.vector_store %arg8[%c0_17, %c0_18], %19 {strides = array<i32>} : memref<8x128xf32, #tpu.memory_space<vmem>>, vector<8x128xf32>,
    return
  }
  func.func @transform_0(%arg0: i32) -> (i32, i32) {
    %c0_i32 = arith.constant 0 : i32
    %c0_i32_0 = arith.constant 0 : i32
    return %arg0, %c0_i32 : i32, i32
  }
  func.func @transform_1(%arg0: i32) -> (i32, i32) {
    %c0_i32 = arith.constant 0 : i32
    %c0_i32_0 = arith.constant 0 : i32
    %c0_i32_1 = arith.constant 0 : i32
    return %c0_i32, %c0_i32_0 : i32, i32
  }
  func.func @transform_2(%arg0: i32) -> (i32, i32) {
    %c0_i32 = arith.constant 0 : i32
    %c0_i32_0 = arith.constant 0 : i32
    %c0_i32_1 = arith.constant 0 : i32
    return %c0_i32, %c0_i32_0 : i32, i32
  }
  func.func @transform_3(%arg0: i32) -> (i32, i32) {
    %c0_i32 = arith.constant 0 : i32
    %c0_i32_0 = arith.constant 0 : i32
    %c0_i32_1 = arith.constant 0 : i32
    return %c0_i32, %c0_i32_0 : i32, i32
  }
  func.func @transform_4(%arg0: i32) -> (i32, i32) {
    %c0_i32 = arith.constant 0 : i32
    %c0_i32_0 = arith.constant 0 : i32
    %c0_i32_1 = arith.constant 0 : i32
    return %c0_i32, %c0_i32_0 : i32, i32
  }
  func.func @transform_5(%arg0: i32) -> (i32, i32) {
    %c0_i32 = arith.constant 0 : i32
    %c0_i32_0 = arith.constant 0 : i32
    %c0_i32_1 = arith.constant 0 : i32
    return %c0_i32, %c0_i32_0 : i32, i32
  }
  func.func @transform_6(%arg0: i32) -> (i32, i32) {
    %c0_i32 = arith.constant 0 : i32
    %c0_i32_0 = arith.constant 0 : i32
    %c0_i32_1 = arith.constant 0 : i32
    return %c0_i32, %c0_i32_0 : i32, i32
  }
  func.func @transform_7(%arg0: i32) -> (i32, i32) {
    %c0_i32 = arith.constant 0 : i32
    %c0_i32_0 = arith.constant 0 : i32
    return %arg0, %c0_i32 : i32, i32
  }
}

</mosaic_0001>

<bundles_post_ra>
// kernel: tpu_custom_call.1
= control target key start
LH: loop header
LB: loop body
LE: loop exit
PB: predicated region body
PF: predicated region fallthrough
CT: control target
= control target key end

     0   :  { %6 = vsyncpa [#allocation3], 0  ;;  %s103_s0 = inlined_call_operand.hbm [shape: f32[8,128], index: 0, kind: input, shape index: {}]   ;;  %s104_s1 = inlined_call_operand.hbm [shape: f32[8,128], index: 1, kind: output, shape index: {}]  }
   0x1   :  { %7 = vsyncpa [#allocation4], 0  ;;  %s85_s6 = smov [#allocation2]  }
   0x2   :  { %s14_s7 = sshll.u32 %s85_s6, 4  ;;  %s15_s7 = int_to_ptr.vmem [resolvable:$true] %s14_s7 }
   0x3   :  { %s49_s8 = scalar_lea.vmem %s15_s7, 128  ;;  %p54_p1 = scmp.lt.s32.totalorder %s15_s7, %s15_s7 }
   0x4   :  { %p50_p0 = scmp.ne.s32.totalorder %s15_s7, %s49_s8  ;;  %p55_p2 = scmp.lt.s32.totalorder %s49_s8, %s49_s8 }
   0x6   :  { %p56_p3 = por %p55_p2, %p54_p1 }
   0x8   :  { %p57_p4 = pnand %p56_p3, %p50_p0 }
   0xa   :  { %60 = shalt.err (!%p57_p4)
}
   0xb   :  { %17 = dma.hbm_to_vmem [thread:$0]  %s103_s0, 128, %s15_s7, [#allocation3]  }
   0xc   :  { %81 = dma.done.wait [#allocation3], 128  }
   0xd   :  { %82 = vsyncadd [#allocation3], 4294967168  ;;  %s86_s11 = smov [#allocation5]   ;;  %v21_v0 = vld [vmem:[#allocation2] sm:$0xff] }
   0xe   :  { %s30_s12 = sshll.u32 %s86_s11, 4  ;;  %v22_v1 = vadd.f32 1.0, %v21_v0  ;;  %s31_s12 = int_to_ptr.vmem [resolvable:$true] %s30_s12 }
   0xf   :  { %s61_s13 = scalar_lea.vmem %s31_s12, 128  ;;  %p66_p6 = scmp.lt.s32.totalorder %s31_s12, %s31_s12 }
  0x10   :  { %23 = vst [vmem:[#allocation5] sm:$0xff] %v22_v1  ;;  %p62_p5 = scmp.ne.s32.totalorder %s31_s12, %s61_s13  ;;  %p67_p7 = scmp.lt.s32.totalorder %s61_s13, %s61_s13 }
  0x12   :  { %p68_p8 = por %p67_p7, %p66_p6 }
  0x14   :  { %p69_p9 = pnand %p68_p8, %p62_p5 }
  0x16   :  { %72 = shalt.err (!%p69_p9)
}
  0x17   :  { %33 = dma.vmem_to_hbm [thread:$0]  %s31_s12, 128, %s104_s1, [#allocation4]  }
  0x18   :  { %83 = dma.done.wait [#allocation4], 128  }
  0x19   :  { %84 = vsyncadd [#allocation4], 4294967168 }
  0x1a   :  { %37 = vsyncpa [#allocation3], 1 }
  0x1b   :  { %38 = vsyncpa [#allocation4], 1 }

// kernel: mlp_forward.1
= control target key start
LH: loop header
LB: loop body
LE: loop exit
PB: predicated region body
PF: predicated region fallthrough
CT: control target
= control target key end

     0   :  { %12 = vsyncpa [#allocation3], 0  ;;  %s711_s0 = inlined_call_operand.vmem [shape: f32[8,128], index: 0, kind: input, shape index: {}]   ;;  %s712_s1 = inlined_call_operand.hbm [shape: f32[128,128], index: 1, kind: input, shape index: {}]   ;;  %s713_s2 = inlined_call_operand.vmem [shape: f32[1,128], index: 2, kind: input, shape index: {}]   ;;  %s714_s3 = inlined_call_operand.hbm [shape: f32[128,128], index: 3, kind: input, shape index: {}]   ;;  %s715_s4 = inlined_call_operand.vmem [shape: f32[1,128], index: 4, kind: input, shape index: {}]   ;;  %s716_s5 = inlined_call_operand.hbm [shape: f32[128,128], index: 5, kind: input, shape index: {}]   ;;  %s717_s6 = inlined_call_operand.vmem [shape: f32[1,128], index: 6, kind: input, shape index: {}]   ;;  %s718_s7 = inlined_call_operand.vmem [shape: f32[8,128], index: 7, kind: output, shape index: {}]  }
   0x1   :  { %13 = vsyncpa [#allocation5], 0  ;;  %s586_s24 = smov [#allocation4]   ;;  %s587_s26 = smov [#allocation2]  }
   0x2   :  { %s35_s25 = sshll.u32 %s586_s24, 4  ;;  %s21_s27 = sshll.u32 %s587_s26, 4  ;;  %s36_s25 = int_to_ptr.vmem [resolvable:$true] %s35_s25  ;;  %s22_s27 = int_to_ptr.vmem [resolvable:$true] %s21_s27 }
   0x3   :  { %s530_s28 = scalar_lea.vmem %s36_s25, 2048  ;;  %p535_p1 = scmp.lt.s32.totalorder %s36_s25, %s36_s25 }
   0x4   :  { %p531_p0 = scmp.ne.s32.totalorder %s36_s25, %s530_s28  ;;  %p536_p2 = scmp.lt.s32.totalorder %s530_s28, %s530_s28 }
   0x6   :  { %p537_p3 = por %p536_p2, %p535_p1 }
   0x8   :  { %p538_p4 = pnand %p537_p3, %p531_p0 }
   0xa   :  { %541 = shalt.err (!%p538_p4)
}
   0xb   :  { %s588_s29 = smov 128   ;;  %s589_s30 = smov 8  }
   0xc   :  { %41 = dma.hbm_to_vmem [thread:$0]  %s714_s3, 2048, %s36_s25, [#allocation5], %s588_s29, %s588_s29, %s589_s30  }
   0xd   :  { %s550_s10 = scalar_lea.vmem %s22_s27, 2048  ;;  %p555_p6 = scmp.lt.s32.totalorder %s22_s27, %s22_s27 }
   0xe   :  { %p551_p5 = scmp.ne.s32.totalorder %s22_s27, %s550_s10  ;;  %p556_p7 = scmp.lt.s32.totalorder %s550_s10, %s550_s10 }
  0x10   :  { %p557_p8 = por %p556_p7, %p555_p6 }
  0x12   :  { %p558_p9 = pnand %p557_p8, %p551_p5 }
  0x14   :  { %561 = shalt.err (!%p558_p9)
}
  0x15   :  { %27 = dma.hbm_to_vmem [thread:$0]  %s712_s1, 2048, %s22_s27, [#allocation3], %s588_s29, %s588_s29, %s589_s30  }
  0x16   :  { %s590_s13 = smov [#allocation6]  }
  0x17   :  { %s49_s14 = sshll.u32 %s590_s13, 4  ;;  %s50_s14 = int_to_ptr.vmem [resolvable:$true] %s49_s14 }
  0x18   :  { %s570_s15 = scalar_lea.vmem %s50_s14, 2048  ;;  %p575_p11 = scmp.lt.s32.totalorder %s50_s14, %s50_s14 }
  0x19   :  { %p571_p10 = scmp.ne.s32.totalorder %s50_s14, %s570_s15  ;;  %p576_p12 = scmp.lt.s32.totalorder %s570_s15, %s570_s15 }
  0x1b   :  { %p577_p13 = por %p576_p12, %p575_p11 }
  0x1d   :  { %p578_p0 = pnand %p577_p13, %p571_p10 }
  0x1f   :  { %581 = shalt.err (!%p578_p0)
}
  0x20   :  { %55 = dma.hbm_to_vmem [thread:$0]  %s716_s5, 2048, %s50_s14, [#allocation5], %s588_s29, %s588_s29, %s589_s30  }
  0x21   :  { %582 = dma.done.wait [#allocation3], 2048  }
  0x22   :  { %583 = vsyncadd [#allocation3], 4294965248 }
  0x23   :  { %584 = dma.done.wait [#allocation5], 4096  }
  0x24   :  { %585 = vsyncadd [#allocation5], 4294963200  ;;  %v591_v0 = vmov 0.0   ;;  %vm592_vm0 = vmmov 0   ;;  %v83_v1 = vld [vmem:[#allocation2 + $0x78] sm:$0xff]  ;;  %v82_v2 = vld [vmem:[#allocation2 + $0x70] sm:$0xff] }
  0x25   :  { %410 = vmatprep.subr.mxu0 %v591_v0  ;;  %442 = vmatprep.mubr.msk.f32.mxu0 %vm592_vm0, %v591_v0  ;;  %v81_v3 = vld [vmem:[#allocation2 + $0x68] sm:$0xff]  ;;  %v80_v4 = vld [vmem:[#allocation2 + $0x60] sm:$0xff]  ;;  %v177_v5 = vld [vmem:[#allocation4 + $0x78] sm:$0xff] }
  0x26   :  { %445 = vmatprep.subr.mxu1 %v591_v0  ;;  %477 = vmatprep.mubr.msk.f32.mxu1 %vm592_vm0, %v591_v0  ;;  %v79_v6 = vld [vmem:[#allocation2 + $0x58] sm:$0xff]  ;;  %v176_v7 = vld [vmem:[#allocation4 + $0x70] sm:$0xff]  ;;  %v175_v8 = vld [vmem:[#allocation4 + $0x68] sm:$0xff] }
  0x27   :  { %411 = vmatpush3.msra.mxu0 %v83_v1  ;;  %446 = vmatpush3.msra.mxu1 %v177_v5  ;;  %v78_v9 = vld [vmem:[#allocation2 + $0x50] sm:$0xff]  ;;  %v174_v10 = vld [vmem:[#allocation4 + $0x60] sm:$0xff]  ;;  %v77_v11 = vld [vmem:[#allocation2 + $0x48] sm:$0xff] }
  0x28   :  { %412 = vmatprep.subr.mxu0 %v591_v0  ;;  %447 = vmatprep.subr.mxu1 %v591_v0  ;;  %v173_v12 = vld [vmem:[#allocation4 + $0x58] sm:$0xff]  ;;  %v76_v13 = vld [vmem:[#allocation2 + $0x40] sm:$0xff]  ;;  %v172_v14 = vld [vmem:[#allocation4 + $0x50] sm:$0xff] }
  0x29   :  { %413 = vmatpush3.msra.mxu0 %v82_v2  ;;  %448 = vmatpush3.msra.mxu1 %v176_v7  ;;  %v75_v15 = vld [vmem:[#allocation2 + $0x38] sm:$0xff]  ;;  %v171_v16 = vld [vmem:[#allocation4 + $0x48] sm:$0xff]  ;;  %v74_v17 = vld [vmem:[#allocation2 + $0x30] sm:$0xff] }
  0x2a   :  { %414 = vmatprep.subr.mxu0 %v591_v0  ;;  %449 = vmatprep.subr.mxu1 %v591_v0  ;;  %v170_v18 = vld [vmem:[#allocation4 + $0x40] sm:$0xff]  ;;  %v73_v19 = vld [vmem:[#allocation2 + $0x28] sm:$0xff]  ;;  %v169_v20 = vld [vmem:[#allocation4 + $0x38] sm:$0xff] }
  0x2b   :  { %415 = vmatpush3.msra.mxu0 %v81_v3  ;;  %450 = vmatpush3.msra.mxu1 %v175_v8  ;;  %v72_v21 = vld [vmem:[#allocation2 + $0x20] sm:$0xff]  ;;  %v168_v22 = vld [vmem:[#allocation4 + $0x30] sm:$0xff]  ;;  %v71_v23 = vld [vmem:[#allocation2 + $0x18] sm:$0xff] }
  0x2c   :  { %416 = vmatprep.subr.mxu0 %v591_v0  ;;  %451 = vmatprep.subr.mxu1 %v591_v0  ;;  %v167_v24 = vld [vmem:[#allocation4 + $0x28] sm:$0xff]  ;;  %v70_v25 = vld [vmem:[#allocation2 + $0x10] sm:$0xff]  ;;  %v166_v26 = vld [vmem:[#allocation4 + $0x20] sm:$0xff] }
  0x2d   :  { %417 = vmatpush3.msra.mxu0 %v80_v4  ;;  %452 = vmatpush3.msra.mxu1 %v174_v10  ;;  %v69_v27 = vld [vmem:[#allocation2 + $0x8] sm:$0xff]  ;;  %v165_v28 = vld [vmem:[#allocation4 + $0x18] sm:$0xff]  ;;  %v68_v29 = vld [vmem:[#allocation2] sm:$0xff] }
  0x2e   :  { %418 = vmatprep.subr.mxu0 %v591_v0  ;;  %453 = vmatprep.subr.mxu1 %v591_v0  ;;  %v67_v30 = vld [vmem:[%s711_s0] sm:$0xff]  ;;  %v164_v31 = vld [vmem:[#allocation4 + $0x10] sm:$0xff]  ;;  %v163_v32 = vld [vmem:[#allocation4 + $0x8] sm:$0xff] }
  0x2f   :  { %419 = vmatpush3.msra.mxu0 %v79_v6  ;;  %454 = vmatpush3.msra.mxu1 %v173_v12  ;;  %v162_v33 = vld [vmem:[#allocation4] sm:$0xff]  ;;  %v271_v34 = vld [vmem:[#allocation6 + $0x78] sm:$0xff]  ;;  %v270_v35 = vld [vmem:[#allocation6 + $0x70] sm:$0xff] }
  0x30   :  { %420 = vmatprep.subr.mxu0 %v591_v0  ;;  %455 = vmatprep.subr.mxu1 %v591_v0  ;;  %v269_v36 = vld [vmem:[#allocation6 + $0x68] sm:$0xff]  ;;  %v268_v37 = vld [vmem:[#allocation6 + $0x60] sm:$0xff]  ;;  %v267_v38 = vld [vmem:[#allocation6 + $0x58] sm:$0xff] }
  0x31   :  { %421 = vmatpush3.msra.mxu0 %v78_v9  ;;  %456 = vmatpush3.msra.mxu1 %v172_v14  ;;  %v266_v39 = vld [vmem:[#allocation6 + $0x50] sm:$0xff]  ;;  %v265_v40 = vld [vmem:[#allocation6 + $0x48] sm:$0xff]  ;;  %v264_v41 = vld [vmem:[#allocation6 + $0x40] sm:$0xff] }
  0x32   :  { %422 = vmatprep.subr.mxu0 %v591_v0  ;;  %457 = vmatprep.subr.mxu1 %v591_v0  ;;  %v263_v42 = vld [vmem:[#allocation6 + $0x38] sm:$0xff]  ;;  %v262_v43 = vld [vmem:[#allocation6 + $0x30] sm:$0xff]  ;;  %v261_v44 = vld [vmem:[#allocation6 + $0x28] sm:$0xff] }
  0x33   :  { %423 = vmatpush3.msra.mxu0 %v77_v11  ;;  %458 = vmatpush3.msra.mxu1 %v171_v16  ;;  %v260_v45 = vld [vmem:[#allocation6 + $0x20] sm:$0xff]  ;;  %v259_v46 = vld [vmem:[#allocation6 + $0x18] sm:$0xff]  ;;  %v258_v52 = vld [vmem:[#allocation6 + $0x10] sm:$0xff] }
  0x34   :  { %424 = vmatprep.subr.mxu0 %v591_v0  ;;  %459 = vmatprep.subr.mxu1 %v591_v0  ;;  %v356_v47 = vld [vmem:[%s713_s2] ss:$0 sm:$0xff]  ;;  %v257_v53 = vld [vmem:[#allocation6 + $0x8] sm:$0xff] }
  0x35   :  { %425 = vmatpush3.msra.mxu0 %v76_v13  ;;  %460 = vmatpush3.msra.mxu1 %v170_v18  ;;  %v256_v54 = vld [vmem:[#allocation6] sm:$0xff] }
  0x36   :  { %426 = vmatprep.subr.mxu0 %v591_v0  ;;  %461 = vmatprep.subr.mxu1 %v591_v0  ;;  %v357_v55 = vld [vmem:[%s715_s4] ss:$0 sm:$0xff] }
  0x37   :  { %427 = vmatpush3.msra.mxu0 %v75_v15  ;;  %462 = vmatpush3.msra.mxu1 %v169_v20  ;;  %v358_v60 = vld [vmem:[%s717_s6] ss:$0 sm:$0xff] }
  0x38   :  { %428 = vmatprep.subr.mxu0 %v591_v0  ;;  %463 = vmatprep.subr.mxu1 %v591_v0 }
  0x39   :  { %429 = vmatpush3.msra.mxu0 %v74_v17  ;;  %464 = vmatpush3.msra.mxu1 %v168_v22 }
  0x3a   :  { %430 = vmatprep.subr.mxu0 %v591_v0  ;;  %465 = vmatprep.subr.mxu1 %v591_v0 }
  0x3b   :  { %431 = vmatpush3.msra.mxu0 %v73_v19  ;;  %466 = vmatpush3.msra.mxu1 %v167_v24 }
  0x3c   :  { %432 = vmatprep.subr.mxu0 %v591_v0  ;;  %467 = vmatprep.subr.mxu1 %v591_v0 }
  0x3d   :  { %433 = vmatpush3.msra.mxu0 %v72_v21  ;;  %468 = vmatpush3.msra.mxu1 %v166_v26 }
  0x3e   :  { %434 = vmatprep.subr.mxu0 %v591_v0  ;;  %469 = vmatprep.subr.mxu1 %v591_v0 }
  0x3f   :  { %435 = vmatpush3.msra.mxu0 %v71_v23  ;;  %470 = vmatpush3.msra.mxu1 %v165_v28 }
  0x40   :  { %436 = vmatprep.subr.mxu0 %v591_v0  ;;  %471 = vmatprep.subr.mxu1 %v591_v0 }
  0x41   :  { %437 = vmatpush3.msra.mxu0 %v70_v25  ;;  %472 = vmatpush3.msra.mxu1 %v164_v31 }
  0x42   :  { %438 = vmatprep.subr.mxu0 %v591_v0  ;;  %473 = vmatprep.subr.mxu1 %v591_v0 }
  0x43   :  { %439 = vmatpush3.msra.mxu0 %v69_v27  ;;  %474 = vmatpush3.msra.mxu1 %v163_v32 }
  0x44   :  { %440 = vmatprep.subr.mxu0 %v591_v0  ;;  %475 = vmatprep.subr.mxu1 %v591_v0 }
  0x45   :  { %441 = vmatpush3.msra.mxu0 %v68_v29  ;;  %476 = vmatpush3.msra.mxu1 %v162_v33 }
  0x46   :  { %443 = vmatmul.mubr.f32.vlgmr.msra.gmra.mxu0 %v67_v30  ;;  %480 = vmatprep.subr.mxu0 %v591_v0 }
  0x47   :  { %512 = vmatprep.mubr.msk.f32.mxu0 %vm592_vm0, %v591_v0  ;;  %481 = vmatpush3.msra.mxu0 %v271_v34 }
  0x48   :  { %482 = vmatprep.subr.mxu0 %v591_v0 }
  0x49   :  { %483 = vmatpush3.msra.mxu0 %v270_v35 }
  0x4a   :  { %484 = vmatprep.subr.mxu0 %v591_v0 }
  0x4b   :  { %485 = vmatpush3.msra.mxu0 %v269_v36 }
  0x4c   :  { %486 = vmatprep.subr.mxu0 %v591_v0 }
  0x4d   :  { %487 = vmatpush3.msra.mxu0 %v268_v37 }
  0x4e   :  { %488 = vmatprep.subr.mxu0 %v591_v0 }
  0x4f   :  { %489 = vmatpush3.msra.mxu0 %v267_v38 }
  0x50   :  { %490 = vmatprep.subr.mxu0 %v591_v0 }
  0x51   :  { %491 = vmatpush3.msra.mxu0 %v266_v39 }
  0x52   :  { %492 = vmatprep.subr.mxu0 %v591_v0 }
  0x53   :  { %493 = vmatpush3.msra.mxu0 %v265_v40 }
  0x54   :  { %494 = vmatprep.subr.mxu0 %v591_v0 }
  0x55   :  { %495 = vmatpush3.msra.mxu0 %v264_v41 }
  0x56   :  { %496 = vmatprep.subr.mxu0 %v591_v0 }
  0x57   :  { %497 = vmatpush3.msra.mxu0 %v263_v42 }
  0x58   :  { %498 = vmatprep.subr.mxu0 %v591_v0 }
  0x59   :  { %499 = vmatpush3.msra.mxu0 %v262_v43 }
  0x5a   :  { %500 = vmatprep.subr.mxu0 %v591_v0 }
  0x5b   :  { %501 = vmatpush3.msra.mxu0 %v261_v44 }
  0x5c   :  { %502 = vmatprep.subr.mxu0 %v591_v0 }
  0x5d   :  { %503 = vmatpush3.msra.mxu0 %v260_v45 }
  0x5e   :  { %504 = vmatprep.subr.mxu0 %v591_v0 }
  0x5f   :  { %505 = vmatpush3.msra.mxu0 %v259_v46 }
  0x60   :  { %506 = vmatprep.subr.mxu0 %v591_v0 }
  0x61   :  { %507 = vmatpush3.msra.mxu0 %v258_v52 }
  0x62   :  { %508 = vmatprep.subr.mxu0 %v591_v0 }
  0x63   :  { %509 = vmatpush3.msra.mxu0 %v257_v53 }
  0x64   :  { %510 = vmatprep.subr.mxu0 %v591_v0 }
  0x65   :  { %511 = vmatpush3.msra.mxu0 %v256_v54 }
 0x106   :  { %v157_v48 = vpop.f32.mrf.mxu0 }
 0x107   :  { %v158_v49 = vadd.f32 %v356_v47, %v157_v48 }
 0x108   :  { %v444_v50 = vpop.f32.mrf.mxu0 }
 0x109   :  { %v161_v51 = vmax.f32 %v158_v49, 0.0 }
 0x10b   :  { %478 = vmatmul.mubr.f32.vlgmr.msra.gmra.mxu1 %v161_v51 }
 0x1cb   :  { %v251_v56 = vpop.f32.mrf.mxu1 }
 0x1cc   :  { %v252_v57 = vadd.f32 %v357_v55, %v251_v56 }
 0x1cd   :  { %v479_v58 = vpop.f32.mrf.mxu1 }
 0x1ce   :  { %v255_v59 = vmax.f32 %v252_v57, 0.0 }
 0x1d0   :  { %513 = vmatmul.mubr.f32.vlgmr.msra.gmra.mxu0 %v255_v59 }
 0x290   :  { %v345_v61 = vpop.f32.mrf.mxu0 }
 0x291   :  { %v346_v62 = vadd.f32 %v358_v60, %v345_v61 }
 0x292   :  { %v514_v63 = vpop.f32.mrf.mxu0 }
 0x293   :  { %349 = vst [vmem:[%s718_s7] sm:$0xff] %v346_v62 }
 0x294   :  { %354 = vsyncpa [#allocation3], 1 }
 0x295   :  { %355 = vsyncpa [#allocation5], 1 }

</bundles_post_ra>
